<compile_context>
chip_gen: v6e
topology: v6e:2x2x1
jax: 0.10.0
libtpu: 0.0.40
codegen_flags: <defaults>
</compile_context>

<pallas_src>
import functools
import math

import jax
import jax.numpy as jnp
from jax import lax
from jax.experimental import pallas as pl
from jax.experimental.pallas import tpu as pltpu


def _sdpa_kernel(q_ref, k_ref, v_ref, ctx_ref, attn_ref, *, inv_dk):
    # One (batch, q-tile) block per grid step; K/V are VMEM-resident across qi.
    q = q_ref[0] * jnp.asarray(inv_dk, dtype=q_ref.dtype)      # (TQ, D) scale folded into Q
    k = k_ref[0]                                               # (Lk, D)
    v = v_ref[0]                                               # (Lk, D)

    # score = (Q/sqrt(d)) @ K^T : contract feature dim of both operands (no K transpose),
    # native dtype into the MXU, f32 accumulation.
    score = lax.dot_general(
        q, k, dimension_numbers=(((1,), (1,)), ((), ())),
        preferred_element_type=jnp.float32)                    # (TQ, Lk) f32

    # numerically stable softmax over keys (f32 on the VPU/EUP)
    m = jnp.max(score, axis=-1, keepdims=True)
    e = jnp.exp(score - m)
    denom = jnp.sum(e, axis=-1, keepdims=True)
    attn = e * pl.reciprocal(denom, approx=False)  # exact: attn is a contract output

    # context = attn @ V  (probabilities cast to V's dtype so the MXU runs native rate)
    ctx = jnp.dot(attn.astype(v.dtype), v, preferred_element_type=jnp.float32)

    ctx_ref[0] = ctx.astype(ctx_ref.dtype)
    attn_ref[0] = attn.astype(attn_ref.dtype)


def _sdpa_masked_kernel(q_ref, k_ref, v_ref, mask_ref, ctx_ref, attn_ref, *, inv_dk):
    q = q_ref[0] * jnp.asarray(inv_dk, dtype=q_ref.dtype)
    k = k_ref[0]
    v = v_ref[0]
    mask = mask_ref[0]                                         # (TQ, Lk) bool

    score = lax.dot_general(
        q, k, dimension_numbers=(((1,), (1,)), ((), ())),
        preferred_element_type=jnp.float32)
    score = jnp.where(mask, jnp.float32(-1e9), score)          # masked_fill_

    m = jnp.max(score, axis=-1, keepdims=True)
    e = jnp.exp(score - m)
    denom = jnp.sum(e, axis=-1, keepdims=True)
    attn = e * pl.reciprocal(denom, approx=False)

    ctx = jnp.dot(attn.astype(v.dtype), v, preferred_element_type=jnp.float32)

    ctx_ref[0] = ctx.astype(ctx_ref.dtype)
    attn_ref[0] = attn.astype(attn_ref.dtype)


def _vmem_limit_bytes():
    # Leave ~25% headroom under physical VMEM (v5e/v6e: 128 MiB, v7x: 64 MiB).
    cap = 64 * 1024 * 1024
    try:
        info = pltpu.get_tpu_info()
        cap = int(getattr(info, "vmem_capacity_bytes", cap))
    except Exception:
        pass
    return int(min(cap * 3 // 4, 100 * 1024 * 1024))


def _choose_tq(Lq, Lk, D, itemsize, budget_bytes):
    """Largest q tile whose double-buffered blocks + f32 temps fit the VMEM budget."""
    kv_resident = 2 * 2 * Lk * D * itemsize                    # K, V (double-buffered)
    for cand in (512, 256, 128, 64, 32, 16, 8):
        tq = min(cand, Lq)                                     # full Lq or a multiple of 8
        per_tile = (2 * 2 * tq * D * itemsize                  # q in + ctx out (double-buffered)
                    + 2 * tq * Lk * itemsize                   # attn out (double-buffered)
                    + 2 * tq * Lk                              # bool mask (double-buffered)
                    + 4 * tq * Lk * 4)                         # f32 score / exp intermediates
        if kv_resident + per_tile <= budget_bytes:
            return tq
    return min(8, Lq)


def scaled_dot_product_attention(query, key, value, dim, mask=None, *, tq=None):
    """Pallas implementation of ScaledDotProductionAttention.forward."""
    B, Lq, D = query.shape
    _, Lk, _ = key.shape
    inv_dk = 1.0 / math.sqrt(dim)

    vmem_limit = _vmem_limit_bytes()
    if tq is None:
        tq = _choose_tq(Lq, Lk, D, jnp.dtype(query.dtype).itemsize,
                        int(vmem_limit * 0.8))
    num_q_tiles = pl.cdiv(Lq, tq)

    out_shape = (
        jax.ShapeDtypeStruct((B, Lq, D), query.dtype),    # context
        jax.ShapeDtypeStruct((B, Lq, Lk), query.dtype),   # attention (matches torch softmax dtype)
    )

    q_spec = pl.BlockSpec((1, tq, D), lambda b, qi: (b, qi, 0))
    # K/V block index is constant along the q-tile axis -> no re-DMA between q tiles.
    k_spec = pl.BlockSpec((1, Lk, D), lambda b, qi: (b, 0, 0))
    v_spec = pl.BlockSpec((1, Lk, D), lambda b, qi: (b, 0, 0))
    ctx_spec = pl.BlockSpec((1, tq, D), lambda b, qi: (b, qi, 0))
    attn_spec = pl.BlockSpec((1, tq, Lk), lambda b, qi: (b, qi, 0))

    compiler_params = pltpu.CompilerParams(
        dimension_semantics=("parallel", "parallel"),
        vmem_limit_bytes=vmem_limit)

    if mask is None:
        kernel = functools.partial(_sdpa_kernel, inv_dk=inv_dk)
        in_specs = [q_spec, k_spec, v_spec]
        args = (query, key, value)
    else:
        mask = jnp.asarray(mask)
        if mask.size == B * Lq * Lk:
            mask = jnp.reshape(mask, (B, Lq, Lk))         # torch: mask.reshape(score.size())
        else:
            mask = jnp.broadcast_to(mask, (B, Lq, Lk))    # tolerate broadcastable masks
        mask = mask.astype(jnp.bool_)
        mask_spec = pl.BlockSpec((1, tq, Lk), lambda b, qi: (b, qi, 0))
        kernel = functools.partial(_sdpa_masked_kernel, inv_dk=inv_dk)
        in_specs = [q_spec, k_spec, v_spec, mask_spec]
        args = (query, key, value, mask)

    return pl.pallas_call(
        kernel,
        out_shape=out_shape,
        grid_spec=pltpu.PrefetchScalarGridSpec(
            num_scalar_prefetch=0,
            grid=(B, num_q_tiles),
            in_specs=in_specs,
            out_specs=[ctx_spec, attn_spec],
        ),
        compiler_params=compiler_params,
    )(*args)


def _reference(query, key, value, dim, mask=None):
    # Pure-JAX reference mirroring the PyTorch forward.
    score = jnp.einsum("bqd,bkd->bqk", query, key) / jnp.sqrt(jnp.float32(dim))
    if mask is not None:
        score = jnp.where(jnp.reshape(mask, score.shape).astype(bool), -1e9, score)
    attn = jax.nn.softmax(score, axis=-1)
    ctx = jnp.einsum("bqk,bkd->bqd", attn, value)
    return ctx, attn


if __name__ == "__main__":
    key0 = jax.random.PRNGKey(0)
    kq, kk, kv, km = jax.random.split(key0, 4)

    # Small shapes matching the module's (batch, seq, d_model) layout.
    B, Lq, Lk, D = 2, 8, 8, 32
    q = jax.random.normal(kq, (B, Lq, D), dtype=jnp.float32)
    k = jax.random.normal(kk, (B, Lk, D), dtype=jnp.float32)
    v = jax.random.normal(kv, (B, Lk, D), dtype=jnp.float32)
    mask = jax.random.bernoulli(km, p=0.25, shape=(B, Lq, Lk))

    # No-mask path
    ctx, attn = scaled_dot_product_attention(q, k, v, D, mask=None)
    jax.block_until_ready((ctx, attn))
    ctx_ref, attn_ref = _reference(q, k, v, D, mask=None)
    assert jnp.allclose(ctx, ctx_ref, atol=1e-4, rtol=1e-4)
    assert jnp.allclose(attn, attn_ref, atol=1e-4, rtol=1e-4)

    # Masked path
    ctx_m, attn_m = scaled_dot_product_attention(q, k, v, D, mask=mask)
    jax.block_until_ready((ctx_m, attn_m))
    ctx_mr, attn_mr = _reference(q, k, v, D, mask=mask)
    assert jnp.allclose(ctx_m, ctx_mr, atol=1e-4, rtol=1e-4)
    assert jnp.allclose(attn_m, attn_mr, atol=1e-4, rtol=1e-4)

    # Exercise the q-tiled path (multiple q tiles per batch element, K/V resident).
    B2, Lq2, Lk2, D2 = 2, 256, 128, 64
    q2 = jax.random.normal(kq, (B2, Lq2, D2), dtype=jnp.float32)
    k2 = jax.random.normal(kk, (B2, Lk2, D2), dtype=jnp.float32)
    v2 = jax.random.normal(kv, (B2, Lk2, D2), dtype=jnp.float32)
    ctx2, attn2 = scaled_dot_product_attention(q2, k2, v2, D2, tq=128)
    jax.block_until_ready((ctx2, attn2))
    ctx2_ref, attn2_ref = _reference(q2, k2, v2, D2)
    assert jnp.allclose(ctx2, ctx2_ref, atol=1e-4, rtol=1e-4)
    assert jnp.allclose(attn2, attn2_ref, atol=1e-4, rtol=1e-4)

    print("KERNEL_OK")
</pallas_src>

<mosaic_0001>
module attributes {stable_mosaic.version = 11 : i64} {
  func.func @_sdpa_kernel(%arg0: i32, %arg1: i32, %arg2: memref<1x8x32xf32, #tpu.memory_space<vmem>>, %arg3: memref<1x8x32xf32, #tpu.memory_space<vmem>>, %arg4: memref<1x8x32xf32, #tpu.memory_space<vmem>>, %arg5: memref<1x8x32xf32, #tpu.memory_space<vmem>>, %arg6: memref<1x8x8xf32, #tpu.memory_space<vmem>>) attributes {dimension_semantics = [#tpu.dimension_semantics<parallel>, #tpu.dimension_semantics<parallel>], iteration_bounds = array<i64: 2, 1>, scalar_prefetch = 0 : i64, scratch_operands = 0 : i64, tpu.core_type = #tpu.core_type<tc>, window_params = [{transform_indices = @transform_0, window_bounds = array<i64: 1, 8, 32>}, {transform_indices = @transform_1, window_bounds = array<i64: 1, 8, 32>}, {transform_indices = @transform_2, window_bounds = array<i64: 1, 8, 32>}, {transform_indices = @transform_3, window_bounds = array<i64: 1, 8, 32>}, {transform_indices = @transform_4, window_bounds = array<i64: 1, 8, 8>}]} {
    %c0 = arith.constant 0 : index
    %c0_0 = arith.constant 0 : index
    %c0_1 = arith.constant 0 : index
    %0 = vector.load %arg2[%c0, %c0_0, %c0_1] : memref<1x8x32xf32, #tpu.memory_space<vmem>>, vector<1x8x32xf32>
    %1 = vector.shape_cast %0 : vector<1x8x32xf32> to vector<8x32xf32>
    %cst = arith.constant 0.176776692 : f32
    %2 = vector.broadcast %cst : f32 to vector<8x32xf32>
    %3 = arith.mulf %1, %2 : vector<8x32xf32>
    %c0_2 = arith.constant 0 : index
    %c0_3 = arith.constant 0 : index
    %c0_4 = arith.constant 0 : index
    %4 = vector.load %arg3[%c0_2, %c0_3, %c0_4] : memref<1x8x32xf32, #tpu.memory_space<vmem>>, vector<1x8x32xf32>
    %5 = vector.shape_cast %4 : vector<1x8x32xf32> to vector<8x32xf32>
    %c0_5 = arith.constant 0 : index
    %c0_6 = arith.constant 0 : index
    %c0_7 = arith.constant 0 : index
    %6 = vector.load %arg4[%c0_5, %c0_6, %c0_7] : memref<1x8x32xf32, #tpu.memory_space<vmem>>, vector<1x8x32xf32>
    %7 = vector.shape_cast %6 : vector<1x8x32xf32> to vector<8x32xf32>
    %cst_8 = arith.constant dense<0.000000e+00> : vector<8x8xf32>
    %8 = tpu.matmul %3, %5, %cst_8 {dimension_numbers = #tpu.dot_dimension_numbers<[1], [1], [0], [0], [0, 0, 1, 0], [], []>} : vector<8x32xf32>, vector<8x32xf32>, vector<8x8xf32> -> vector<8x8xf32>
    %cst_9 = arith.constant dense<0xFF800000> : vector<8xf32>
    %9 = vector.multi_reduction <maximumf>, %8, %cst_9 [1] : vector<8x8xf32> to vector<8xf32>
    %10 = vector.shape_cast %9 : vector<8xf32> to vector<8x1xf32>
    %11 = vector.broadcast %10 : vector<8x1xf32> to vector<8x8xf32>
    %12 = arith.subf %8, %11 : vector<8x8xf32>
    %13 = math.exp %12 : vector<8x8xf32>
    %cst_10 = arith.constant dense<0.000000e+00> : vector<8xf32>
    %14 = vector.multi_reduction <add>, %13, %cst_10 [1] : vector<8x8xf32> to vector<8xf32>
    %15 = vector.shape_cast %14 : vector<8xf32> to vector<8x1xf32>
    %16 = tpu.reciprocal %15 : vector<8x1xf32> -> vector<8x1xf32>
    %17 = vector.broadcast %16 : vector<8x1xf32> to vector<8x8xf32>
    %18 = arith.mulf %13, %17 : vector<8x8xf32>
    %cst_11 = arith.constant dense<0.000000e+00> : vector<8x32xf32>
    %19 = tpu.matmul %18, %7, %cst_11 {dimension_numbers = #tpu.dot_dimension_numbers<[1], [0], [0], [1], [0, 0, 1, 1], [], []>} : vector<8x8xf32>, vector<8x32xf32>, vector<8x32xf32> -> vector<8x32xf32>
    %c0_12 = arith.constant 0 : index
    %c0_13 = arith.constant 0 : index
    %c0_14 = arith.constant 0 : index
    %20 = vector.load %arg5[%c0_12, %c0_13, %c0_14] : memref<1x8x32xf32, #tpu.memory_space<vmem>>, vector<1x8x32xf32>
    %21 = vector.shape_cast %20 : vector<1x8x32xf32> to vector<8x32xf32>
    %22 = vector.shape_cast %19 : vector<8x32xf32> to vector<1x8x32xf32>
    tpu.vector_store %arg5[%c0_12, %c0_13, %c0_14], %22 {strides = array<i32>} : memref<1x8x32xf32, #tpu.memory_space<vmem>>, vector<1x8x32xf32>,
    %c0_15 = arith.constant 0 : index
    %c0_16 = arith.constant 0 : index
    %c0_17 = arith.constant 0 : index
    %23 = vector.load %arg6[%c0_15, %c0_16, %c0_17] : memref<1x8x8xf32, #tpu.memory_space<vmem>>, vector<1x8x8xf32>
    %24 = vector.shape_cast %23 : vector<1x8x8xf32> to vector<8x8xf32>
    %25 = vector.shape_cast %18 : vector<8x8xf32> to vector<1x8x8xf32>
    tpu.vector_store %arg6[%c0_15, %c0_16, %c0_17], %25 {strides = array<i32>} : memref<1x8x8xf32, #tpu.memory_space<vmem>>, vector<1x8x8xf32>,
    return
  }
  func.func @transform_0(%arg0: i32, %arg1: i32) -> (i32, i32, i32) {
    %c0_i32 = arith.constant 0 : i32
    %c0_i32_0 = arith.constant 0 : i32
    return %arg0, %arg1, %c0_i32 : i32, i32, i32
  }
  func.func @transform_1(%arg0: i32, %arg1: i32) -> (i32, i32, i32) {
    %c0_i32 = arith.constant 0 : i32
    %c0_i32_0 = arith.constant 0 : i32
    %c0_i32_1 = arith.constant 0 : i32
    return %arg0, %c0_i32, %c0_i32_0 : i32, i32, i32
  }
  func.func @transform_2(%arg0: i32, %arg1: i32) -> (i32, i32, i32) {
    %c0_i32 = arith.constant 0 : i32
    %c0_i32_0 = arith.constant 0 : i32
    %c0_i32_1 = arith.constant 0 : i32
    return %arg0, %c0_i32, %c0_i32_0 : i32, i32, i32
  }
  func.func @transform_3(%arg0: i32, %arg1: i32) -> (i32, i32, i32) {
    %c0_i32 = arith.constant 0 : i32
    %c0_i32_0 = arith.constant 0 : i32
    return %arg0, %arg1, %c0_i32 : i32, i32, i32
  }
  func.func @transform_4(%arg0: i32, %arg1: i32) -> (i32, i32, i32) {
    %c0_i32 = arith.constant 0 : i32
    %c0_i32_0 = arith.constant 0 : i32
    return %arg0, %arg1, %c0_i32 : i32, i32, i32
  }
}

</mosaic_0001>

<bundles_post_ra>
// kernel: tpu_custom_call.1
= control target key start
LH: loop header
LB: loop body
LE: loop exit
PB: predicated region body
PF: predicated region fallthrough
CT: control target
= control target key end

     0   :  { %s1264_s0 = inlined_call_operand.hbm [shape: f32[2,8,32], index: 0, kind: input, shape index: {}]   ;;  %s1265_s1 = inlined_call_operand.hbm [shape: f32[2,8,32], index: 1, kind: input, shape index: {}]   ;;  %s1266_s2 = inlined_call_operand.hbm [shape: f32[2,8,32], index: 2, kind: input, shape index: {}]   ;;  %s1267_s3 = inlined_call_operand.hbm [shape: f32[2,8,32], index: 3, kind: output, shape index: {0}]   ;;  %s1268_s4 = inlined_call_operand.hbm [shape: f32[2,8,8], index: 4, kind: output, shape index: {1}]  }
   0x1   :  { %1272 = sst [smem:[#allocation18_spill]] %s1265_s1 }
   0x2   :  { %10 = vsyncpa [#allocation3], 0 }
   0x3   :  { %12 = vsyncpa [#allocation3 + $0x1], 0 }
   0x4   :  { %13 = vsyncpa [#allocation6], 0 }
   0x5   :  { %15 = vsyncpa [#allocation6 + $0x1], 0 }
   0x6   :  { %16 = vsyncpa [#allocation4], 0 }
   0x7   :  { %18 = vsyncpa [#allocation4 + $0x1], 0 }
   0x8   :  { %19 = vsyncpa [#allocation10], 0 }
   0x9   :  { %21 = vsyncpa [#allocation10 + $0x1], 0  ;;  %s1026_s15 = smov 0   ;;  %s1028_s16 = smov 0  }
   0xa   :  { %s1030_s17 = smov 0   ;;  %s1032_s18 = smov 0  }
   0xb   :  { %s1034_s19 = smov 0   ;;  %s1036_s20 = smov 0  }
   0xc LB: > { %1273 = sst [smem:[#allocation15_spill]] %s988_s19  ;;  %s1057_s21 = sadd.s32 4294967295, %s992_s20   ;;  %s992_s20 = sphi %s1036_s20, %s27_s20   ;;  %s988_s19 = sphi %s1034_s19, %s1287_s19   ;;  %s984_s18 = sphi %s1032_s18, %s1286_s18   ;;  %s980_s17 = sphi %s1030_s17, %s1290_s17   ;;  %s976_s16 = sphi %s1028_s16, %s1289_s16   ;;  %s972_s15 = sphi %s1026_s15, %s1288_s15  }
   0xd   : > { %s673_s22 = sadd.s32 4294967294, %s992_s20   ;;  %s39_s23 = sadd.s32 1, %s988_s19 }
   0xe   : > { %s48_s24 = sadd.s32 1, %s980_s17  ;;  %p41_p0 = scmp.ge.s32.totalorder %s39_s23, 2 }
   0xf   : > { %p55_p1 = scmp.ne.s32.totalorder %s980_s17, %s976_s16  ;;  %p56_p2 = scmp.eq.s32.totalorder %s992_s20, 0 }
  0x10   : > { %p61_p3 = scmp.ne.s32.totalorder %s976_s16, %s972_s15  ;;  %s1292_s23 = smov (%p41_p0, %s39_s23), 0 }
  0x11   : > { %1274 = sst [smem:[#allocation16_spill]] %s1292_s23  ;;  %p1069_p4 = por %p56_p2, %p55_p1 }
  0x12   : > { %p62_p5 = scmp.eq.s32.totalorder %s1057_s21, 0  ;;  %s43_s26 = ssub.s32 %s988_s19, %s1292_s23 }
  0x13   : > { %p139_p6 = scmp.eq.s32.totalorder %s1057_s21, 1  ;;  %p46_p7 = scmp.eq.s32.totalorder %s43_s26, 0 }
  0x14   : > { %p1077_p8 = por %p62_p5, %p61_p3  ;;  %p145_p10 = scmp.eq.s32.totalorder %s673_s22, 1 }
  0x15   : > { %p1081_p9 = por %p139_p6, %p55_p1  ;;  %p738_p13 = scmp.lt.s32.totalorder %s992_s20, 2 }
  0x16   : > { %s1086_s29 = scalar_select %p46_p7, %s980_s17, %s48_s24  }
  0x17   : > { %p1088_p11 = por %p145_p10, %p61_p3  ;;  %s1269_s5 = sand.u32 1, %s980_s17  }
  0x18   : > { %1278 = sst [smem:[#allocation17_spill]] %s1086_s29  ;;  %s1097_s6 = sshll.u32 %s1269_s5, 3 }
  0x19   : > { %s1100_s7 = sshll.u32 %s988_s19, 7  ;;  %p1104_p0 = pnand %p738_p13, %p1069_p4 }
  0x1a   : > { %s212_s9 = sand.u32 1, %s992_s20   ;;  %s1281_s1 = sld [smem:[#allocation18_spill]] }
  0x1b   : > { %s216_s13 = scalar_lea.vmem [#allocation5], %s1097_s6  ;;  %p682_p1 = scmp.ge.s32.totalorder %s992_s20, 1 }
  0x1c   : > { %s223_s14 = sshll.u32 %s216_s13, 4  ;;  %p246_p2 = scmp.lt.s32.totalorder %s992_s20, 3  ;;  %s224_s14 = int_to_ptr.vmem [resolvable:$true] %s223_s14 }
  0x1d   : > { %s1116_s22 = scalar_lea.sflag [#allocation6], %s212_s9  ;;  %p796_p3 = pneg %p1104_p0 }
  0x1e   : > { %s807_s24 = scalar_lea.vmem %s224_s14, 128  ;;  %s994_s25 = smov [#allocation5]  }
  0x1f   : > { %p808_p4 = scmp.ne.s32.totalorder %s224_s14, %s807_s24  ;;  %s812_s26 = sshll.u32 %s994_s25, 4  ;;  %s813_s26 = int_to_ptr.vmem [resolvable:$false] %s812_s26 }
  0x20   : > { %s221_s12 = scalar_lea.hbm %s1281_s1, %s1100_s7  ;;  %s814_s10 = scalar_lea.vmem %s813_s26, 256 }
  0x21   : > { %p810_p5 = pnand %p808_p4, %p796_p3  ;;  %p815_p7 = scmp.lt.s32.totalorder %s224_s14, %s813_s26 }
  0x22   : > { %p816_p10 = scmp.lt.s32.totalorder %s814_s10, %s807_s24 }
  0x23   : > { %p811_p6 = pneg %p810_p5 }
  0x24   : > { %p817_p13 = por %p816_p10, %p815_p7 }
  0x26   : > { %p818_p12 = pnand %p817_p13, %p811_p6 }
  0x28   : > { %821 = shalt.err (!%p818_p12)
}
  0x29   : > { %727 = dma.hbm_to_vmem [thread:$0]  (!%p1104_p0), %s221_s12, 128, %s224_s14, %s1116_s22  }
  0x2a   : > { %p1130_p4 = pnand %p682_p1, %p246_p2  ;;  %s203_s24 = scalar_lea.hbm %s1264_s0, %s1100_s7 }
  0x2b   : > { %s197_s25 = scalar_lea.vmem [#allocation2], %s1097_s6  ;;  %s239_s1 = scalar_lea.hbm %s1266_s2, %s1100_s7 }
  0x2c   : > { %s205_s26 = sshll.u32 %s197_s25, 4  ;;  %s1283_s23 = sand.u32 1, %s980_s17   ;;  %s206_s26 = int_to_ptr.vmem [resolvable:$true] %s205_s26 }
  0x2d   : > { %s194_s19 = scalar_lea.sflag [#allocation3], %s1283_s23  ;;  %s835_s12 = scalar_lea.vmem %s206_s26, 128 }
  0x2e   : > { %p836_p12 = scmp.ne.s32.totalorder %s206_s26, %s835_s12  ;;  %s995_s14 = smov [#allocation2]  }
  0x2f   : > { %s840_s29 = sshll.u32 %s995_s14, 4  ;;  %s841_s29 = int_to_ptr.vmem [resolvable:$false] %s840_s29 }
  0x30   : > { %p838_p1 = pnand %p836_p12, %p796_p3  ;;  %s842_s11 = scalar_lea.vmem %s841_s29, 256 }
  0x31   : > { %p843_p5 = scmp.lt.s32.totalorder %s206_s26, %s841_s29  ;;  %p844_p6 = scmp.lt.s32.totalorder %s842_s11, %s835_s12 }
  0x32   : > { %p839_p2 = pneg %p838_p1 }
  0x33   : > { %p845_p7 = por %p844_p6, %p843_p5 }
  0x35   : > { %p846_p10 = pnand %p845_p7, %p839_p2 }
  0x37   : > { %849 = shalt.err (!%p846_p10)
}
  0x38   : > { %724 = dma.hbm_to_vmem [thread:$0]  (!%p1104_p0), %s203_s24, 128, %s206_s26, %s194_s19  }
  0x39   : > { %s234_s23 = scalar_lea.vmem [#allocation7], %s1097_s6  ;;  %s996_s25 = smov [#allocation7]  }
  0x3a   : > { %s241_s5 = sshll.u32 %s234_s23, 4  ;;  %s868_s29 = sshll.u32 %s996_s25, 4  ;;  %s242_s5 = int_to_ptr.vmem [resolvable:$true] %s241_s5  ;;  %s869_s29 = int_to_ptr.vmem [resolvable:$false] %s868_s29 }
  0x3b   : > { %s863_s13 = scalar_lea.vmem %s242_s5, 128  ;;  %s870_s10 = scalar_lea.vmem %s869_s29, 256 }
  0x3c   : > { %p864_p13 = scmp.ne.s32.totalorder %s242_s5, %s863_s13  ;;  %p871_p2 = scmp.lt.s32.totalorder %s242_s5, %s869_s29 }
  0x3d   : > { %p872_p5 = scmp.lt.s32.totalorder %s870_s10, %s863_s13 }
  0x3e   : > { %p866_p12 = pnand %p864_p13, %p796_p3 }
  0x3f   : > { %p873_p6 = por %p872_p5, %p871_p2 }
  0x40   : > { %p867_p1 = pneg %p866_p12 }
  0x42   : > { %p874_p7 = pnand %p873_p6, %p867_p1 }
  0x44   : > { %877 = shalt.err (!%p874_p7)
}
  0x45   : > { %730 = dma.hbm_to_vmem [thread:$0]  (!%p1104_p0), %s239_s1, 128, %s242_s5, %s1116_s22  }
  0x46   : > { %250 = sbr.rel (%p1130_p4) target bundleno = 797 (0x31d), region = 32  ;;  %s1165_s24 = sand.u32 (!%p1130_p4), 1, %s976_s16  }
  0x47   : > { %s1168_s26 = sshll.u32 (!%p1130_p4), %s1165_s24, 3  ;;  %s253_s8 = scalar_lea.sflag (!%p1130_p4), [#allocation3], %s1165_s24 }
  0x48   : > { %s256_s12 = scalar_lea.vmem (!%p1130_p4), [#allocation2], %s1168_s26 }
  0x4b   : > { %955 = dma.done.wait (%p1077_p8), %s253_s8, 128  }
  0x4c   : > { %957 = vsyncadd (%p1077_p8), %s253_s8, 4294967168  ;;  %s261_s1 = sand.u32 1, %s1057_s21   ;;  %s265_s22 = scalar_lea.vmem [#allocation5], %s1168_s26 }
  0x4d   : > { %s262_s7 = scalar_lea.sflag [#allocation6], %s261_s1 }
  0x4e   : > { %959 = dma.done.wait (%p1077_p8), %s262_s7, 256  }
  0x4f   : > { %961 = vsyncadd (%p1077_p8), %s262_s7, 4294967040  ;;  %v997_v0 = vmov 0.0   ;;  %vm998_vm0 = vmmov 0   ;;  %vm318_vm1 = vcmask 261120   ;;  %v316_v1 = vld [vmem:[%s265_s22] sm:$0xff]  ;;  %v314_v2 = vld [vmem:[%s256_s12] sm:$0xff] }
  0x50   : > { %701 = vmatprep.subr.mxu0 %v997_v0  ;;  %703 = vmatprep.mubr.msk.f32.mxu0 %vm998_vm0, %v997_v0  ;;  %v315_v3 = vmul.f32 0.17677669, %v314_v2  ;;  %vm395_vm2 = vcmask 64512   ;;  %s274_s21 = scalar_lea.vmem [#allocation7], %s1168_s26  ;;  %s313_s27 = scalar_lea.vmem [#allocation9], %s1168_s26 }
  0x51   : > { %706 = vmatprep.subr.mxu1 %v997_v0  ;;  %708 = vmatprep.mubr.msk.f32.mxu1 %vm998_vm0, %v997_v0  ;;  %v317_v12 = vld [vmem:[%s274_s21] sm:$0xff]  ;;  %s693_s9 = sshll.u32 %s984_s18, 7  ;;  %s516_s5 = sshll.u32 %s313_s27, 4  ;;  %s517_s5 = int_to_ptr.vmem [resolvable:$true] %s516_s5 }
  0x52   : > { %702 = vmatpush3.xpose.msk.msra.mxu0 %vm318_vm1, %v316_v1  ;;  %707 = vmatpush3.msra.mxu1 %v317_v12  ;;  %s514_s23 = scalar_lea.hbm %s1268_s4, %s693_s9  ;;  %s488_s13 = scalar_lea.sflag [#allocation10], %s1165_s24 }
  0x53   : > { %s878_s25 = scalar_lea.vmem %s517_s5, 128  ;;  %s999_s29 = smov [#allocation9]  }
  0x54   : > { %p879_p8 = scmp.ne.s32.totalorder %s517_s5, %s878_s25  ;;  %s882_s10 = sshll.u32 %s999_s29, 4  ;;  %s883_s10 = int_to_ptr.vmem [resolvable:$false] %s882_s10 }
  0x55   : > { %704 = vmatmul.mubr.msk.f32.vlgmr.msra.gmra.mxu0 %vm318_vm1, %v315_v3  ;;  %s884_s19 = scalar_lea.vmem %s883_s10, 256  ;;  %p885_p4 = scmp.lt.s32.totalorder %s517_s5, %s883_s10 }
  0x56   : > { %p880_p0 = pnand %p879_p8, %p1081_p9  ;;  %p886_p10 = scmp.lt.s32.totalorder %s884_s19, %s878_s25 }
  0x58   : > { %p881_p3 = pneg %p880_p0  ;;  %p887_p13 = por %p886_p10, %p885_p4 }
  0x5a   : > { %p888_p12 = pnand %p887_p13, %p881_p3 }
 0x115   : > { %v391_v4 = vpop.f32.mrf.mxu0 }
 0x116   : > { %v396_v5 = vsel %vm395_vm2, %v391_v4, -inf }
 0x117   : > { %397 = vmax.xlane.f32.xlu0 %v396_v5  ;;  %v705_v6 = vpop.f32.mrf.mxu0 }
 0x1a0   : > { %v398_v7 = vpop.xlane.xlu0 %397 }
 0x1a1   : > { %v399_v8 = vsub.f32 %v391_v4, %v398_v7 }
 0x1a3   : > { %v400_v9 = vmul.f32 1.442695, %v399_v8 }
 0x1a5   : > { %790 = vpow2.f32 %v400_v9 }
 0x1b2   : > { %v791_v10 = vpop.eup %790 }
 0x1b3   : > { %v402_v11 = vsel %vm395_vm2, %v791_v10, 0.0 }
 0x1b4   : > { %403 = vadd.xlane.f32.xlu0 %v402_v11 }
 0x23d   : > { %v404_v13 = vpop.xlane.xlu0 %403 }
 0x23e   : > { %792 = vrcp.f32 %v404_v13 }
 0x24b   : > { %v793_v14 = vpop.eup %792 }
 0x24c   : > { %v406_v15 = vmul.f32 %v793_v14, %v791_v10 }
 0x24e   : > { %709 = vmatmul.mubr.msk.f32.vlgmr.msra.gmra.mxu1 %vm395_vm2, %v406_v15  ;;  %481 = vst.msk [vmem:[%s313_s27] sm:$0xff] %vm395_vm2, %v406_v15 }
 0x24f   : > { %891 = shalt.err (!%p888_p12)
}
 0x250   : > { %s892_s6 = scalar_lea.hbm %s514_s23, 128  ;;  %s896_s1 = scalar_lea.hbm %s1268_s4, 256 }
 0x251   : > { %p893_p1 = scmp.ne.s32.totalorder %s514_s23, %s892_s6  ;;  %p897_p6 = scmp.lt.s32.totalorder %s514_s23, %s1268_s4 }
 0x252   : > { %p898_p7 = scmp.lt.s32.totalorder %s896_s1, %s892_s6 }
 0x253   : > { %p894_p2 = pnand %p893_p1, %p1081_p9 }
 0x254   : > { %p899_p8 = por %p898_p7, %p897_p6 }
 0x255   : > { %p895_p5 = pneg %p894_p2 }
 0x257   : > { %p900_p0 = pnand %p899_p8, %p895_p5 }
 0x259   : > { %903 = shalt.err (!%p900_p0)
}
 0x25a   : > { %718 = dma.vmem_to_hbm [thread:$0]  (%p1081_p9), %s517_s5, 128, %s514_s23, %s488_s13  }
 0x25b   : > { %s306_s21 = scalar_lea.vmem [#allocation8], %s1168_s26  ;;  %s1215_s25 = scalar_lea.hbm %s1267_s3, %s693_s9 }
 0x25c   : > { %s502_s27 = sshll.u32 %s306_s21, 4  ;;  %s483_s29 = scalar_lea.sflag [#allocation4], %s1165_s24  ;;  %s1217_s27 = int_to_ptr.vmem [resolvable:$true] %s502_s27 }
 0x25d   : > { %s904_s10 = scalar_lea.vmem %s1217_s27, 128  ;;  %s1000_s18 = smov [#allocation8]  }
 0x25e   : > { %p905_p3 = scmp.ne.s32.totalorder %s1217_s27, %s904_s10  ;;  %s908_s26 = sshll.u32 %s1000_s18, 4  ;;  %s909_s26 = int_to_ptr.vmem [resolvable:$false] %s908_s26 }
 0x25f   : > { %s910_s9 = scalar_lea.vmem %s909_s26, 256  ;;  %p911_p13 = scmp.lt.s32.totalorder %s1217_s27, %s909_s26 }
 0x260   : > { %p906_p4 = pnand %p905_p3, %p1081_p9  ;;  %p912_p12 = scmp.lt.s32.totalorder %s910_s9, %s904_s10 }
 0x262   : > { %p907_p10 = pneg %p906_p4  ;;  %p913_p1 = por %p912_p12, %p911_p13 }
 0x264   : > { %p914_p2 = pnand %p913_p1, %p907_p10 }
 0x30e   : > { %v476_v16 = vpop.f32.mrf.mxu1 }
 0x30f   : > { %480 = vst.msk [vmem:[%s306_s21] sm:$0xff] %vm318_vm1, %v476_v16 }
 0x310   : > { %v710_v17 = vpop.f32.mrf.mxu1 }
 0x311   : > { %917 = shalt.err (!%p914_p2)
}
 0x312   : > { %s918_s23 = scalar_lea.hbm %s1215_s25, 128  ;;  %s922_s13 = scalar_lea.hbm %s1267_s3, 256 }
 0x313   : > { %p919_p5 = scmp.ne.s32.totalorder %s1215_s25, %s918_s23  ;;  %p923_p8 = scmp.lt.s32.totalorder %s1215_s25, %s1267_s3 }
 0x314   : > { %p924_p0 = scmp.lt.s32.totalorder %s922_s13, %s918_s23 }
 0x315   : > { %p920_p6 = pnand %p919_p5, %p1081_p9 }
 0x316   : > { %p925_p3 = por %p924_p0, %p923_p8 }
 0x317   : > { %p921_p7 = pneg %p920_p6 }
 0x319   : > { %p926_p4 = pnand %p925_p3, %p921_p7 }
 0x31b   : > { %929 = shalt.err (!%p926_p4)
}
 0x31c   : > { %717 = dma.vmem_to_hbm [thread:$0]  (%p1081_p9), %s1217_s27, 128, %s1215_s25, %s483_s29  }
 0x31d PF: > { %s528_s8 = sand.u32 1, %s972_s15   ;;  %p1284_p10 = scmp.ge.s32.totalorder %s992_s20, 2 }
 0x31e   : > { %s529_s12 = scalar_lea.sflag [#allocation4], %s528_s8 }
 0x31f   : > { %p732_p13 = pnand %p1284_p10, %p1088_p11 }
 0x321   : > { %p733_p12 = pneg %p732_p13 }
 0x323   : > { %963 = dma.done.wait (%p733_p12), %s529_s12, 128  }
 0x324   : > { %965 = vsyncadd (%p733_p12), %s529_s12, 4294967168  ;;  %s538_s1 = scalar_lea.sflag [#allocation10], %s528_s8 }
 0x325   : > { %967 = dma.done.wait (%p733_p12), %s538_s1, 128  }
 0x326   : > { %969 = vsyncadd (%p733_p12), %s538_s1, 4294967168  ;;  %s27_s20 = sadd.s32 1, %s992_s20   ;;  %s1285_s28 = sld [smem:[#allocation17_spill]] }
 0x327   : > { %p24_p1 = scmp.ge.s32.totalorder %s27_s20, 4   ;;  %s1286_s18 = sld [smem:[#allocation15_spill]] }
 0x328   : > { %s1287_s19 = sld [smem:[#allocation16_spill]]  ;;  %s1288_s15 = smov %s976_s16 }
 0x329   : > { %s1289_s16 = smov %s980_s17  ;;  %26 = sbr.rel (!%p24_p1) target bundleno = 12 (0xc), region = 118 }
 0x32c   : > { %s1290_s17 = smov %s1285_s28 }
 0x32e   :  { %543 = vsyncpa [#allocation3], 1 }
 0x32f   :  { %545 = vsyncpa [#allocation3 + $0x1], 1 }
 0x330   :  { %546 = vsyncpa [#allocation6], 1 }
 0x331   :  { %548 = vsyncpa [#allocation6 + $0x1], 1 }
 0x332   :  { %549 = vsyncpa [#allocation4], 1 }
 0x333   :  { %551 = vsyncpa [#allocation4 + $0x1], 1 }
 0x334   :  { %552 = vsyncpa [#allocation10], 1 }
 0x335   :  { %554 = vsyncpa [#allocation10 + $0x1], 1 }

</bundles_post_ra>
